<compile_context>
chip_gen: v7x
topology: tpu7x:2x2x1
jax: 0.10.0
libtpu: 0.0.40
codegen_flags: <defaults>
</compile_context>

<pallas_src>
import jax
import jax.numpy as jnp
import numpy as np
from jax.experimental import pallas as pl
from jax.experimental.pallas import tpu as pltpu


# ------------------------------- Pallas kernel -------------------------------

def _attention_eval_kernel(lens_ref, enc_ref, h_ref, out_ref):
    """Fused AttentionEval forward for one batch row.

    lens_ref: [B]        int32 valid encoder lengths (SMEM, scalar prefetch)
    enc_ref:  [1, S, H]  encoder outputs for this batch row (VMEM)
    h_ref:    [1, 1, H]  decoder hidden state h_n for this batch row (VMEM)
    out_ref:  [1, 1, 2H] concat([h_n, attn_context], -1) (VMEM)
    """
    b = pl.program_id(0)
    S = enc_ref.shape[1]

    enc = enc_ref[0]                                     # [S, H] native dtype
    dec = h_ref[0]                                       # [1, H]

    # scores[q, s] = sum_h dec[q, h] * enc[s, h]   (== bmm(dec, enc^T))
    # -> MXU contraction, f32 accumulation, no transpose materialized.
    scores = jnp.einsum("qh,sh->qs", dec, enc,
                        preferred_element_type=jnp.float32)       # [1, S]

    # length mask built in-kernel: keep score where pos < len, else -1e9.
    pos = jax.lax.broadcasted_iota(jnp.int32, (1, S), 1)
    scores = jnp.where(pos < lens_ref[b], scores, -1.0e9)

    # numerically-stable softmax; normalization deferred past 2nd contraction.
    m = jnp.max(scores, axis=-1, keepdims=True)                   # [1, 1]
    e = jnp.exp(scores - m)                                       # [1, S]
    denom = jnp.sum(e, axis=-1, keepdims=True)                    # [1, 1]

    # context[q, h] = sum_s p[q, s] * enc[s, h]   (== bmm(enc^T, p^T)^T)
    # -> second MXU contraction on the *unnormalized* weights, then one
    #    reciprocal-scale on the [1, H] result (EUP slot).
    attn_un = jnp.einsum("qs,sh->qh", e.astype(enc.dtype), enc,
                         preferred_element_type=jnp.float32)      # [1, H]
    attn = attn_un * pl.reciprocal(denom, approx=True)            # [1, H]

    # single full-row store: concat((dec_output, final_attn_output), dim=2)
    out_ref[0] = jnp.concatenate(
        [dec.astype(out_ref.dtype), attn.astype(out_ref.dtype)], axis=-1)


# --------------------------------- wrapper ------------------------------------

def attention_eval_forward(enc_output, h_n, de_lens):
    """JAX/Pallas equivalent of AttentionEval.forward(enc_output, h_n, de_lens).

    enc_output: [B, S, H] float   (S must equal create_mask's max_len)
    h_n:        [B, H]    float
    de_lens:    [B]       int     valid encoder lengths
    returns:    [B, 1, 2H] float32
    """
    B, S, H = enc_output.shape
    lens = de_lens.astype(jnp.int32)          # scalar-prefetch operand (SMEM)
    h3 = h_n.reshape(B, 1, H)                 # metadata-only reshape

    grid_spec = pltpu.PrefetchScalarGridSpec(
        num_scalar_prefetch=1,
        grid=(B,),
        in_specs=[
            pl.BlockSpec((1, S, H), lambda b, lens: (b, 0, 0)),       # enc
            pl.BlockSpec((1, 1, H), lambda b, lens: (b, 0, 0)),       # h_n
        ],
        out_specs=pl.BlockSpec((1, 1, 2 * H), lambda b, lens: (b, 0, 0)),
    )

    out = pl.pallas_call(
        _attention_eval_kernel,
        out_shape=jax.ShapeDtypeStruct((B, 1, 2 * H), jnp.float32),
        grid_spec=grid_spec,
        compiler_params=pltpu.CompilerParams(
            dimension_semantics=("parallel",)),
    )(lens, enc_output, h3)
    return out                                 # already [B, 1, 2H]


# --------------------------- pure-JAX reference --------------------------------

def ref_attention_eval(enc_output, h_n, de_lens, max_len):
    dec = h_n[:, None, :]                                              # [B, 1, H]
    scores = jnp.einsum("bqh,bsh->bqs", dec, enc_output)               # [B, 1, S]
    pos = jnp.arange(max_len)[None, :]
    mask = jnp.where(pos < de_lens[:, None], 0.0, -1.0e9)[:, None, :]  # [B, 1, max_len]
    scores = scores + mask
    p = jax.nn.softmax(scores, axis=2)
    attn = jnp.einsum("bqs,bsh->bqh", p, enc_output)                   # [B, 1, H]
    return jnp.concatenate([dec, attn], axis=2)                        # [B, 1, 2H]


# ----------------------------------- main --------------------------------------

if __name__ == "__main__":
    B, H = 2, 32
    S = MAX_LEN = 60   # reference hardcodes create_mask(max_len=60); S must match

    key = jax.random.PRNGKey(0)
    ke, kh = jax.random.split(key)
    enc_output = jax.random.normal(ke, (B, S, H), jnp.float32)
    h_n = jax.random.normal(kh, (B, H), jnp.float32)
    de_lens = jnp.array([S, S // 2], dtype=jnp.int32)

    out = attention_eval_forward(enc_output, h_n, de_lens)
    out = jax.block_until_ready(out)

    ref = ref_attention_eval(enc_output, h_n, de_lens, MAX_LEN)
    np.testing.assert_allclose(np.asarray(out), np.asarray(ref), rtol=1e-2, atol=1e-2)
    assert out.shape == (B, 1, 2 * H)
    print("KERNEL_OK")
</pallas_src>

<mosaic_0001>
module attributes {stable_mosaic.version = 11 : i64} {
  func.func @_attention_eval_kernel(%arg0: i32, %arg1: memref<2xi32, #tpu.memory_space<smem>>, %arg2: memref<1x60x32xf32, #tpu.memory_space<vmem>>, %arg3: memref<1x1x32xf32, #tpu.memory_space<vmem>>, %arg4: memref<1x1x64xf32, #tpu.memory_space<vmem>>) attributes {dimension_semantics = [#tpu.dimension_semantics<parallel>], iteration_bounds = array<i64: 2>, scalar_prefetch = 1 : i64, scratch_operands = 0 : i64, tpu.core_type = #tpu.core_type<tc>, window_params = [{transform_indices = @transform_0, window_bounds = array<i64: 1, 60, 32>}, {transform_indices = @transform_1, window_bounds = array<i64: 1, 1, 32>}, {transform_indices = @transform_2, window_bounds = array<i64: 1, 1, 64>}]} {
    %c0 = arith.constant 0 : index
    %c0_0 = arith.constant 0 : index
    %c0_1 = arith.constant 0 : index
    %0 = vector.load %arg2[%c0, %c0_0, %c0_1] : memref<1x60x32xf32, #tpu.memory_space<vmem>>, vector<1x60x32xf32>
    %1 = vector.shape_cast %0 : vector<1x60x32xf32> to vector<60x32xf32>
    %c0_2 = arith.constant 0 : index
    %c0_3 = arith.constant 0 : index
    %c0_4 = arith.constant 0 : index
    %2 = vector.load %arg3[%c0_2, %c0_3, %c0_4] : memref<1x1x32xf32, #tpu.memory_space<vmem>>, vector<1x1x32xf32>
    %3 = vector.shape_cast %2 : vector<1x1x32xf32> to vector<1x32xf32>
    "tpu.trace_start"() <{level = 10 : i32, message = "qh,sh->qs"}> : () -> ()
    %cst = arith.constant dense<0.000000e+00> : vector<1x60xf32>
    %4 = tpu.matmul %3, %1, %cst {dimension_numbers = #tpu.dot_dimension_numbers<[1], [1], [0], [0], [0, 0, 1, 0], [], []>} : vector<1x32xf32>, vector<60x32xf32>, vector<1x60xf32> -> vector<1x60xf32>
    "tpu.trace_stop"() : () -> ()
    %5 = tpu.iota {dimensions = array<i32: 1>} : vector<1x60xi32>
    %6 = arith.index_cast %arg0 : i32 to index
    %7 = memref.load %arg1[%6] : memref<2xi32, #tpu.memory_space<smem>>
    %8 = vector.broadcast %7 : i32 to vector<1x60xi32>
    %9 = arith.cmpi slt, %5, %8 : vector<1x60xi32>
    %cst_5 = arith.constant -1.000000e+09 : f32
    %10 = vector.broadcast %cst_5 : f32 to vector<1x60xf32>
    %11 = arith.select %9, %4, %10 : vector<1x60xi1>, vector<1x60xf32>
    %cst_6 = arith.constant dense<0xFF800000> : vector<1xf32>
    %12 = vector.multi_reduction <maximumf>, %11, %cst_6 [1] : vector<1x60xf32> to vector<1xf32>
    %13 = vector.shape_cast %12 : vector<1xf32> to vector<1x1xf32>
    %14 = vector.broadcast %13 : vector<1x1xf32> to vector<1x60xf32>
    %15 = arith.subf %11, %14 : vector<1x60xf32>
    %16 = math.exp %15 : vector<1x60xf32>
    %cst_7 = arith.constant dense<0.000000e+00> : vector<1xf32>
    %17 = vector.multi_reduction <add>, %16, %cst_7 [1] : vector<1x60xf32> to vector<1xf32>
    %18 = vector.shape_cast %17 : vector<1xf32> to vector<1x1xf32>
    "tpu.trace_start"() <{level = 10 : i32, message = "qs,sh->qh"}> : () -> ()
    %cst_8 = arith.constant dense<0.000000e+00> : vector<1x32xf32>
    %19 = tpu.matmul %16, %1, %cst_8 {dimension_numbers = #tpu.dot_dimension_numbers<[1], [0], [0], [1], [0, 0, 1, 1], [], []>} : vector<1x60xf32>, vector<60x32xf32>, vector<1x32xf32> -> vector<1x32xf32>
    "tpu.trace_stop"() : () -> ()
    %20 = tpu.reciprocal %18 {approx = true} : vector<1x1xf32> -> vector<1x1xf32>
    %21 = vector.broadcast %20 : vector<1x1xf32> to vector<1x32xf32>
    %22 = arith.mulf %19, %21 : vector<1x32xf32>
    %23 = tpu.concatenate %3, %22 in 1 : vector<1x32xf32>, vector<1x32xf32> -> vector<1x64xf32>
    %c0_9 = arith.constant 0 : index
    %c0_10 = arith.constant 0 : index
    %c0_11 = arith.constant 0 : index
    %24 = vector.load %arg4[%c0_9, %c0_10, %c0_11] : memref<1x1x64xf32, #tpu.memory_space<vmem>>, vector<1x1x64xf32>
    %25 = vector.shape_cast %24 : vector<1x1x64xf32> to vector<1x64xf32>
    %26 = vector.shape_cast %23 : vector<1x64xf32> to vector<1x1x64xf32>
    tpu.vector_store %arg4[%c0_9, %c0_10, %c0_11], %26 {strides = array<i32>} : memref<1x1x64xf32, #tpu.memory_space<vmem>>, vector<1x1x64xf32>,
    return
  }
  func.func @transform_0(%arg0: i32, %arg1: memref<2xi32, #tpu.memory_space<smem>>) -> (i32, i32, i32) {
    %c0_i32 = arith.constant 0 : i32
    %c0_i32_0 = arith.constant 0 : i32
    %c0_i32_1 = arith.constant 0 : i32
    return %arg0, %c0_i32, %c0_i32_0 : i32, i32, i32
  }
  func.func @transform_1(%arg0: i32, %arg1: memref<2xi32, #tpu.memory_space<smem>>) -> (i32, i32, i32) {
    %c0_i32 = arith.constant 0 : i32
    %c0_i32_0 = arith.constant 0 : i32
    %c0_i32_1 = arith.constant 0 : i32
    return %arg0, %c0_i32, %c0_i32_0 : i32, i32, i32
  }
  func.func @transform_2(%arg0: i32, %arg1: memref<2xi32, #tpu.memory_space<smem>>) -> (i32, i32, i32) {
    %c0_i32 = arith.constant 0 : i32
    %c0_i32_0 = arith.constant 0 : i32
    %c0_i32_1 = arith.constant 0 : i32
    return %arg0, %c0_i32, %c0_i32_0 : i32, i32, i32
  }
}

</mosaic_0001>

<bundles_post_ra>
// kernel: tpu_custom_call.1
= control target key start
LH: loop header
LB: loop body
LE: loop exit
PB: predicated region body
PF: predicated region fallthrough
CT: control target
= control target key end

     0   :  { %s837_s0 = inlined_call_operand.vmem [shape: s32[2], index: 0, kind: input, shape index: {}]   ;;  %s838_s1 = inlined_call_operand.vmem [shape: f32[2,60,32], index: 1, kind: input, shape index: {}]   ;;  %s839_s2 = inlined_call_operand.vmem [shape: f32[2,1,32], index: 2, kind: input, shape index: {}]   ;;  %s840_s3 = inlined_call_operand.hbm [shape: f32[2,1,64], index: 3, kind: output, shape index: {}]  }
   0x1   :  { %s8_s14 = sshll.u32 %s837_s0, 4  ;;  %s9_s14 = int_to_ptr.vmem [resolvable:$true] %s8_s14 }
   0x2   :  { %s603_s15 = scalar_lea.vmem %s9_s14, 16  ;;  %p608_p1 = scmp.lt.s32.totalorder %s9_s14, %s9_s14 }
   0x3   :  { %p604_p0 = scmp.ne.s32.totalorder %s9_s14, %s603_s15  ;;  %p609_p2 = scmp.lt.s32.totalorder %s603_s15, %s603_s15 }
   0x5   :  { %p610_p3 = por %p609_p2, %p608_p1 }
   0x7   :  { %p611_p4 = pnand %p610_p3, %p604_p0 }
   0x9   :  { %614 = shalt.err (!%p611_p4)  }
   0xa   :  { %s681_s16 = smov [#allocation3]  }
   0xb   :  { %11 = dma.vmem_to_smem %s9_s14, 16, %s681_s16, [#allocation2] }
   0xc   :  { %659 = dma.done.wait [#allocation2], 16 }
   0xd   :  { %660 = vsyncadd [#allocation2], 4294967280 }
   0xe   :  { %13 = sfence }
   0xf   :  { %14 = vsyncpa [#allocation5], 0 }
  0x10   :  { %16 = vsyncpa [#allocation5 + $0x1], 0  ;;  %s711_s17 = smov 0   ;;  %s713_s18 = smov 0  }
  0x11   :  { %s715_s0 = smov 0   ;;  %s717_s19 = smov 0  }
  0x12 LB: > { %s732_s20 = sadd.s32 4294967295, %s679_s19   ;;  %s448_s21 = sadd.s32 4294967294, %s679_s19   ;;  %s679_s19 = sphi %s717_s19, %s848_s19   ;;  %s675_s0 = sphi %s715_s0, %s847_s0   ;;  %s671_s18 = sphi %s713_s18, %s846_s18   ;;  %s667_s17 = sphi %s711_s17, %s845_s17  }
  0x13   : > { %s736_s22 = sadd.s32 1, %s679_s19   ;;  %s81_s23 = sadd.s32 1, %s675_s0 }
  0x14   : > { %s78_s24 = ssub.s32 %s679_s19, %s736_s22  ;;  %p91_p5 = scmp.ne.s32.totalorder %s675_s0, %s671_s18 }
  0x15   : > { %p79_p6 = scmp.eq.s32.totalorder %s78_s24, 0  ;;  %p92_p7 = scmp.eq.s32.totalorder %s732_s20, 1 }
  0x16   : > { %p97_p8 = scmp.ne.s32.totalorder %s671_s18, %s667_s17  ;;  %p98_p9 = scmp.eq.s32.totalorder %s448_s21, 1 }
  0x17   : > { %s747_s25 = scalar_select %p79_p6, %s675_s0, %s81_s23  }
  0x18   : > { %p749_p10 = por %p92_p7, %p91_p5  ;;  %p753_p11 = por %p98_p9, %p97_p8 }
  0x19   : > { %p451_p12 = scmp.ge.s32.totalorder %s679_s19, 1  ;;  %p130_p13 = scmp.lt.s32.totalorder %s679_s19, 3 }
  0x1b   : > { %p131_p0 = pnand %p451_p12, %p130_p13 }
  0x1c   : > { %p154_p1 = scmp.lt.s32.totalorder (!%p131_p0), %s732_s20, 1  ;;  %v682_v0 = vmov (!%p131_p0), 0.0|0.0   ;;  %vm683_vm0 = vmmov (!%p131_p0), 0   ;;  %v684_v1 = vmov (!%p131_p0), 0.0   ;;  %vm171_vm1 = vcmask (!%p131_p0), 261120   ;;  %s271_s9 = sld [smem:[#allocation3 + %s732_s20]] (!%p131_p0) }
  0x1d   : > { %134 = sbr.rel (%p131_p0) target bundleno = 789 (0x315), region = 28  ;;  %525 = vmatprep.subr.bf16.mxu0 (!%p131_p0), %v682_v0  ;;  %503 = vmatprep.mubr.msk.f32.mxu0 (!%p131_p0), %vm683_vm0, %v684_v1  ;;  %vm769_vm2 = vmpackc.low (!%p131_p0), %vm171_vm1, %vm171_vm1  ;;  %v269_v16 = vlaneseq (!%p131_p0)  ;;  %vm275_vm4 = vcmask (!%p131_p0), 483328   ;;  %vm289_vm5 = vcmask (!%p131_p0), 1043456   ;;  %vm685_vm6 = vmmov (!%p131_p0), 1   ;;  %s686_s10 = smov (!%p131_p0), 32  }
  0x1e   : > { %541 = vmatprep.subr.bf16.mxu1 (!%p131_p0), %v682_v0  ;;  %522 = vmatprep.mubr.msk.f32.mxu1 (!%p131_p0), %vm683_vm0, %v684_v1  ;;  %vm552_vm7 = vmpackc.low (!%p131_p0), %vm289_vm5, %vm685_vm6  ;;  %vm285_vm8 = vcmask (!%p131_p0), 490496   ;;  %s152_s11 = sand.u32 (!%p131_p0), 1, %s671_s18   ;;  %s465_s12 = sshll.u32 (!%p131_p0), %s732_s20, 4  ;;  %vm369_vm9 = vcmask (!%p131_p0), 516096  }
  0x1f   : > { %v270_v17 = vand.u32 (!%p131_p0), 127, %v269_v16  ;;  %s153_s13 = scalar_lea.vmem (!%p131_p0), [#allocation4], %s152_s11  ;;  %s794_s21 = scalar_lea.hbm (!%p131_p0), %s840_s3, %s465_s12 }
  0x20   : > { %s384_s14 = sshll.u32 (!%p131_p0), %s153_s13, 4  ;;  %s372_s23 = scalar_lea.sflag (!%p131_p0), [#allocation5], %s152_s11  ;;  %s796_s14 = int_to_ptr.vmem [resolvable:$true] %s384_s14 }
  0x21   : > { %s615_s24 = scalar_lea.vmem (!%p131_p0), %s796_s14, 16 }
  0x22   : > { %v272_v18 = vstv (!%p131_p0), %s271_s9  ;;  %p616_p2 = scmp.ne.s32.totalorder (!%p131_p0), %s796_s14, %s615_s24 }
  0x23   : > { %vm273_vm3 = vcmp.lt.s32.totalorder (!%p131_p0), %v270_v17, %v272_v18 }
  0x24   : > { %s761_s28 = scalar_select %p154_p1, %s732_s20, 1 }
  0x25   : > { %p617_p3 = pnand %p616_p2, %p749_p10  ;;  %s687_s20 = smov [#allocation4]  }
  0x26   : > { %s468_s29 = sshll.u32 %s761_s28, 6  ;;  %s161_s8 = scalar_lea.vmem %s839_s2, %s761_s28 }
  0x27   : > { %s158_s5 = scalar_lea.vmem %s838_s1, %s468_s29  ;;  %v170_v15 = vld [vmem:[%s161_s8] sm:$0x1]  ;;  %p618_p4 = pneg %p617_p3 }
  0x28   : > { %v162_v2 = vld [vmem:[%s158_s5] sm:$0xff]  ;;  %v163_v3 = vld [vmem:[%s158_s5 + $0x8] sm:$0xff]  ;;  %v164_v6 = vld [vmem:[%s158_s5 + $0x10] sm:$0xff]  ;;  %s619_s28 = sshll.u32 %s687_s20, 4  ;;  %s620_s28 = int_to_ptr.vmem [resolvable:$false] %s619_s28 }
  0x29   : > { %v526_v5 = vpack.c.bf16 %v163_v3, %v162_v2  ;;  %v165_v7 = vld [vmem:[%s158_s5 + $0x18] sm:$0xff]  ;;  %v166_v9 = vld [vmem:[%s158_s5 + $0x20] sm:$0xff]  ;;  %v167_v10 = vld [vmem:[%s158_s5 + $0x28] sm:$0xff]  ;;  %s621_s29 = scalar_lea.vmem %s620_s28, 32  ;;  %p622_p5 = scmp.lt.s32.totalorder %s796_s14, %s620_s28 }
  0x2a   : > { %v530_v8 = vpack.c.bf16 %v165_v7, %v164_v6  ;;  %v534_v11 = vpack.c.bf16 %v167_v10, %v166_v9  ;;  %v168_v12 = vld [vmem:[%s158_s5 + $0x30] sm:$0xff]  ;;  %v169_v13 = vld [vmem:[%s158_s5 + $0x38] sm:$0xf]  ;;  %p623_p6 = scmp.lt.s32.totalorder %s621_s29, %s615_s24 }
  0x2b   : > { %528 = vmatpush3.bf16.xpose.msk.msra.mxu0 %vm769_vm2, %v526_v5  ;;  %543 = vmatpush3.bf16.msra.mxu1 %v526_v5  ;;  %v538_v14 = vpack.c.bf16 %v169_v13, %v168_v12 }
  0x2c   : > { %529 = vmatprep.subr.bf16.mxu0 %v682_v0  ;;  %544 = vmatprep.subr.bf16.mxu1 %v682_v0  ;;  %p624_p7 = por %p623_p6, %p622_p5 }
  0x2e   : > { %p625_p8 = pnand %p624_p7, %p618_p4 }
  0x2f   : > { %546 = vmatpush3.bf16.msra.mxu1 %v530_v8 }
  0x30   : > { %547 = vmatprep.subr.bf16.mxu1 %v682_v0 }
  0x33   : > { %532 = vmatpush3.bf16.xpose.msk.msra.mxu0 %vm769_vm2, %v530_v8  ;;  %549 = vmatpush3.bf16.msra.mxu1 %v534_v11 }
  0x34   : > { %533 = vmatprep.subr.bf16.mxu0 %v682_v0  ;;  %550 = vmatprep.subr.bf16.mxu1 %v682_v0 }
  0x37   : > { %553 = vmatpush3.bf16.msk.msra.mxu1 %vm552_vm7, %v538_v14 }
  0x3b   : > { %536 = vmatpush3.bf16.xpose.msk.msra.mxu0 %vm769_vm2, %v534_v11 }
  0x3c   : > { %537 = vmatprep.subr.bf16.mxu0 %v682_v0 }
  0x43   : > { %540 = vmatpush3.bf16.xpose.msk.msra.mxu0 %vm769_vm2, %v538_v14 }
  0x4a   : > { %504 = vmatmul.mubr.msk.f32.vlgmr.msra.gmra.mrb[0].mxu0 %vm171_vm1, %v170_v15 }
 0x11d   : > { %v265_v19 = vpop.f32.mrb[0].mxu0 }
 0x11e   : > { %v274_v20 = vsel %vm273_vm3, %v265_v19, -1e+09  ;;  %v505_v21 = vpop.f32.mrb[1].mxu0 }
 0x11f   : > { %v276_v22 = vsel %vm275_vm4, %v274_v20, -inf }
 0x120   : > { %277 = vmax.xlane.f32.xlu0 %v276_v22 }
 0x1ad   : > { %v278_v23 = vpop.xlane.xlu0 %277 }
 0x1ae   : > { %v279_v24 = vsub.f32 %v274_v20, %v278_v23 }
 0x1b0   : > { %v280_v25 = vmul.f32 1.442695, %v279_v24 }
 0x1b2   : > { %599 = vpow2.f32 %v280_v25 }
 0x1bc   : > { %v600_v26 = vpop.eup %599 }
 0x1bd   : > { %523 = vmatmul.mubr.msk.f32.vlgmr.msra.gmra.mrb[0].mxu1 %vm285_vm8, %v600_v26  ;;  %v282_v27 = vsel %vm275_vm4, %v600_v26, 0.0 }
 0x1be   : > { %283 = vadd.xlane.f32.xlu0 %v282_v27 }
 0x24b   : > { %v284_v28 = vpop.xlane.xlu0 %283 }
 0x24c   : > { %601 = vrcp.f32 %v284_v28 }
 0x256   : > { %v602_v29 = vpop.eup %601 }
 0x290   : > { %v358_v30 = vpop.f32.mrb[0].mxu1 }
 0x291   : > { %v363_v31 = vmul.f32 %v602_v29, %v358_v30  ;;  %v524_v32 = vpop.f32.mrb[1].mxu1 }
 0x293   : > { %365 = vrot.lane.b32.xlu1 %v363_v31, %s686_s10 }
 0x305   : > { %v366_v33 = vpop.permute.xlu1 %365 }
 0x306   : > { %v368_v34 = vsel %vm171_vm1, %v170_v15, %v366_v33 }
 0x307   : > { %370 = vst.msk [vmem:[%s153_s13] sm:$0x1] %vm369_vm9, %v368_v34 }
 0x308   : > { %628 = shalt.err (!%p625_p8)
}
 0x309   : > { %s629_s30 = scalar_lea.hbm %s794_s21, 16  ;;  %s633_s6 = scalar_lea.hbm %s840_s3, 32 }
 0x30a   : > { %p630_p9 = scmp.ne.s32.totalorder %s794_s21, %s629_s30  ;;  %p634_p0 = scmp.lt.u32.totalorder %s794_s21, %s840_s3 }
 0x30b   : > { %p635_p1 = scmp.lt.u32.totalorder %s633_s6, %s629_s30  ;;  %p637_p3 = scmp.lt.u32.totalorder %s629_s30, %s794_s21 }
 0x30c   : > { %p631_p12 = pnand %p630_p9, %p749_p10 }
 0x30d   : > { %p636_p2 = por %p635_p1, %p634_p0 }
 0x30e   : > { %p632_p13 = pneg %p631_p12 }
 0x30f   : > { %p638_p4 = por %p637_p3, %p636_p2 }
 0x311   : > { %p639_p5 = pnand %p638_p4, %p632_p13 }
 0x313   : > { %642 = shalt.err (!%p639_p5)
}
 0x314   : > { %554 = dma.vmem_to_hbm [thread:$0]  (%p749_p10), %s796_s14, 16, %s794_s21, %s372_s23  }
 0x315 PF: > { %p560_p6 = scmp.ge.s32.totalorder %s679_s19, 2  ;;  %s396_s9 = sand.u32 1, %s667_s17  }
 0x316   : > { %s397_s10 = scalar_lea.sflag [#allocation5], %s396_s9 }
 0x317   : > { %p557_p7 = pnand %p560_p6, %p753_p11 }
 0x319   : > { %662 = dma.done.wait (!%p557_p7), %s397_s10, 16  }
 0x31a   : > { %664 = vsyncadd (!%p557_p7), %s397_s10, 4294967280  ;;  %p19_p8 = scmp.ge.s32.totalorder %s736_s22, 4   ;;  %s845_s17 = smov %s671_s18 }
 0x31b   : > { %s846_s18 = smov %s675_s0  ;;  %s847_s0 = smov %s747_s25 }
 0x31c   : > { %s848_s19 = smov %s736_s22  ;;  %21 = sbr.rel (!%p19_p8) target bundleno = 18 (0x12), region = 66 }
 0x323   :  { %401 = vsyncpa [#allocation5], 1 }
 0x324   :  { %403 = vsyncpa [#allocation5 + $0x1], 1 }

</bundles_post_ra>
